<compile_context>
chip_gen: v7x
topology: tpu7x:2x2x1
jax: 0.10.0
libtpu: 0.0.40
codegen_flags: <defaults>
</compile_context>

<pallas_src>
import functools
import math

import jax
import jax.numpy as jnp
from jax import lax
from jax.experimental import pallas as pl
from jax.experimental.pallas import tpu as pltpu

_SQRT2 = math.sqrt(2.0)
_LANES = 128
_PCTS = (0.999, 0.9999, 0.99999)
_SCORE_MAX_ROWS = 1024          # in dbl-buf ~1 MiB + ~1.5 MiB f32 accumulator scratch


def _round_up(v, m):
    return ((v + m - 1) // m) * m


@functools.lru_cache(maxsize=1)
def _device_kind():
    try:
        return jax.devices()[0].device_kind.lower()
    except Exception:
        return ""


def _is_v7x():
    return "v7" in _device_kind()


def _num_score_splits():
    # Only 2-TensorCore chips (v7x) benefit from splitting the score reduction.
    return 2 if _is_v7x() else 1


def _quant_max_rows():
    # v7x's 3.2 TB/s HBM drains small tiles faster than the ~0.35us/step
    # overhead, so use bigger blocks there (~8 MiB VMEM at 4096 rows, f32 in+out).
    return 4096 if _is_v7x() else 1024


# ----------------------------------------------------------------------------
# Quantizer math (shared by both kernels)
# ----------------------------------------------------------------------------
def _dequant_from_log2(log2x, delta, log2_delta, odd_delta, n_levels):
    """Log-sqrt2 quantize/dequantize given precomputed log2(x).

    Matches the torch reference:
      x_int   = round(-2*log2(x/delta))
      mask    = x_int >= n_levels                -> output 0
      x_quant = clamp(x_int, 0, n_levels-1)
      out     = 2^(-ceil(x_quant/2)) * (x_quant%2*(sqrt2-1)+1) * delta
    VALU-trimmed: no mod (parity = 2*ceil(q/2)-q reuses the ceil), no upper
    clip (mask handles it), delta folded into the affine (odd_delta =
    (sqrt2-1)*delta).  The where() is applied before any error is formed so
    masked/NaN lanes never leak.
    """
    x_int = jnp.round(-2.0 * (log2x - log2_delta))
    mask = x_int >= float(n_levels)
    x_quant = jnp.maximum(x_int, 0.0)
    half_ceil = jnp.ceil(x_quant * 0.5)
    parity = half_ceil + half_ceil - x_quant          # == x_quant % 2 (integer q)
    x_float_q = jnp.exp2(-half_ceil) * (parity * odd_delta + delta)
    return jnp.where(mask, 0.0, x_float_q)


# ----------------------------------------------------------------------------
# Kernels
# ----------------------------------------------------------------------------
def _score_kernel(n_levels, n_cand, inner, block_rows, rows_valid, needs_mask,
                  deltas_ref, log2_deltas_ref, odd_deltas_ref,
                  x_ref, o_ref, acc_ref):
    """Fused candidate-delta score pass.

    Accumulates per-lane sums of (x - q(x, delta_d))^2 for all candidates in a
    VMEM scratch; at the last inner step it reduces across sublanes (XLU) and
    writes only a (n_cand, 128) block per split.
    """
    j = pl.program_id(1)

    @pl.when(j == 0)
    def _():
        acc_ref[...] = jnp.zeros_like(acc_ref)

    x = x_ref[...].astype(jnp.float32)
    if needs_mask:
        # Only the very last block of the grid can be ragged; mask OOB rows to 0
        # (quantize(0) -> 0, so they contribute zero error).  Static flag: this
        # code is only emitted when the slab does not divide evenly.
        row0 = (pl.program_id(0) * inner + j) * block_rows
        rid = lax.broadcasted_iota(jnp.int32, x.shape, 0)
        x = jnp.where(rid < rows_valid - row0, x, 0.0)

    log2x = jnp.log2(x)                                  # shared across candidates
    for d in range(n_cand):
        xq = _dequant_from_log2(log2x, deltas_ref[d], log2_deltas_ref[d],
                                odd_deltas_ref[d], n_levels)
        err = x - xq
        acc_ref[d] = acc_ref[d] + err * err              # pure VPU adds

    @pl.when(j == inner - 1)
    def _():
        for d in range(n_cand):                          # sublane reduce on XLU
            o_ref[d, :] = jnp.sum(acc_ref[d], axis=0)


def _quant_kernel(n_levels, scal_ref, x_ref, o_ref):
    """Final quantize/dequantize.  scal = [delta, log2(delta), (sqrt2-1)*delta]."""
    x = x_ref[...].astype(jnp.float32)
    xq = _dequant_from_log2(jnp.log2(x), scal_ref[0], scal_ref[1], scal_ref[2],
                            n_levels)
    o_ref[...] = xq.astype(o_ref.dtype)


# ----------------------------------------------------------------------------
# Layout / tiling helpers
# ----------------------------------------------------------------------------
def _prepare_slab(x):
    """Reshape x into a lane-dense (rows, 128) slab; copy-free when possible."""
    flat = x.reshape(-1)
    n = int(flat.shape[0])
    if n % _LANES == 0:
        return flat.reshape(n // _LANES, _LANES), False
    # TODO(synk): the <128-element ragged-lane tail still pays one pad copy in
    # and one slice copy out; a masked-store tail kernel would remove it.
    pad = _round_up(n, _LANES) - n
    flat = jnp.concatenate([flat, jnp.zeros((pad,), flat.dtype)])
    return flat.reshape(-1, _LANES), True


def _pick_block_rows(rows, max_rows, min_grid):
    """Rows per block: multiple of 8 (sublane-safe) or the full slab extent."""
    if rows <= 8:
        return max(rows, 1)
    target = max(8, pl.cdiv(rows, max(min_grid, 1)))
    br = min(max_rows, _round_up(target, 8))
    if br >= rows:
        return rows                        # single full-extent block (always legal)
    return br


def _score_layout(rows, nsplit, max_rows):
    """Pick (block_rows, nsplit, inner) so the grid exactly covers the slab with
    no fully-empty blocks and at most one ragged block."""
    nsplit = max(1, nsplit)
    block_rows = _pick_block_rows(rows, max_rows, nsplit)
    nblocks = pl.cdiv(rows, block_rows)
    if nsplit > 1 and nblocks % nsplit != 0:
        new_br = None
        cand = ((block_rows - 1) // 8) * 8
        while cand >= 8:
            if pl.cdiv(rows, cand) % nsplit == 0:
                new_br = cand
                break
            cand -= 8
        if new_br is None:
            nsplit = 1
        else:
            block_rows = new_br
            nblocks = pl.cdiv(rows, new_br)
    return block_rows, nsplit, nblocks // nsplit


# ----------------------------------------------------------------------------
# pallas_call wrappers
# ----------------------------------------------------------------------------
def _score_candidates(x2d, deltas, n_levels):
    """sum((x - quantize(x, delta_d))^2) over the slab for every candidate d."""
    n_cand = int(deltas.shape[0])
    rows = int(x2d.shape[0])
    block_rows, nsplit, inner = _score_layout(rows, _num_score_splits(),
                                              _SCORE_MAX_ROWS)
    needs_mask = (rows % block_rows) != 0
    n_elems = rows * _LANES

    deltas = deltas.astype(jnp.float32)
    log2_deltas = jnp.log2(deltas)
    odd_deltas = deltas * jnp.float32(_SQRT2 - 1.0)

    out = pl.pallas_call(
        functools.partial(_score_kernel, n_levels, n_cand, inner, block_rows,
                          rows, needs_mask),
        out_shape=jax.ShapeDtypeStruct((nsplit, n_cand, _LANES), jnp.float32),
        grid_spec=pltpu.PrefetchScalarGridSpec(
            num_scalar_prefetch=3,
            grid=(nsplit, inner),
            in_specs=[pl.BlockSpec((block_rows, _LANES),
                                   lambda i, j, *_: (i * inner + j, 0))],
            out_specs=pl.BlockSpec((None, n_cand, _LANES),
                                   lambda i, j, *_: (i, 0, 0)),
            scratch_shapes=[pltpu.VMEM((n_cand, block_rows, _LANES), jnp.float32)],
        ),
        compiler_params=pltpu.CompilerParams(
            dimension_semantics=("parallel", "arbitrary")),
        cost_estimate=pl.CostEstimate(
            flops=45 * n_elems,
            transcendentals=4 * n_elems,
            bytes_accessed=n_elems * int(jnp.dtype(x2d.dtype).itemsize)),
    )(deltas, log2_deltas, odd_deltas, x2d)
    # Tiny cross-lane / cross-split reduction done once, outside the kernel.
    return jnp.sum(out, axis=(0, 2))                      # (n_cand,)


def _quantize_slab(x2d, scal, n_levels, out_dtype):
    rows = int(x2d.shape[0])
    min_grid = 2 if _is_v7x() else 1                      # keep both v7x TCs busy
    block_rows = _pick_block_rows(rows, _quant_max_rows(), min_grid)
    nsteps = pl.cdiv(rows, block_rows)
    n_elems = rows * _LANES
    bytes_per_elem = int(jnp.dtype(x2d.dtype).itemsize) + int(
        jnp.dtype(out_dtype).itemsize)
    return pl.pallas_call(
        functools.partial(_quant_kernel, n_levels),
        out_shape=jax.ShapeDtypeStruct((rows, _LANES), out_dtype),
        grid_spec=pltpu.PrefetchScalarGridSpec(
            num_scalar_prefetch=1,
            grid=(nsteps,),
            in_specs=[pl.BlockSpec((block_rows, _LANES), lambda i, *_: (i, 0))],
            out_specs=pl.BlockSpec((block_rows, _LANES), lambda i, *_: (i, 0)),
        ),
        compiler_params=pltpu.CompilerParams(dimension_semantics=("parallel",)),
        cost_estimate=pl.CostEstimate(
            flops=14 * n_elems,
            transcendentals=2 * n_elems,
            bytes_accessed=n_elems * bytes_per_elem),
    )(scal, x2d)


# ----------------------------------------------------------------------------
# Module
# ----------------------------------------------------------------------------
class LogSqrt2Quantizer:
    """JAX/Pallas port of the PyTorch LogSqrt2Quantizer forward pass."""

    def __init__(self, n_bits: int = 8, channel_wise: bool = False):
        assert 2 <= n_bits <= 8, "bitwidth not supported"
        self.n_bits = n_bits
        self.n_levels = 2 ** n_bits
        self.delta = None
        self.inited = False
        self._scal = None
        # channel_wise is stored but (as in the reference forward) unused.
        self.channel_wise = channel_wise

    def _init_quantization_scale(self, x, x2d, n_true):
        flat = x.reshape(-1).astype(jnp.float32)
        positions = [p * (n_true - 1) for p in _PCTS]
        min_lo = min(int(math.floor(p)) for p in positions)
        k = max(1, n_true - min_lo)              # only the top ~0.1% is needed
        topk = lax.top_k(flat, k)[0]             # descending order statistics
        delta = topk[0]                          # fallback: x.max()
        cands = []
        for pos in positions:                    # linear interp == torch.quantile
            lo = int(math.floor(pos))
            hi = int(math.ceil(pos))
            frac = jnp.float32(pos - lo)
            v_lo = topk[n_true - 1 - lo]
            v_hi = topk[n_true - 1 - hi]
            cands.append(v_lo + (v_hi - v_lo) * frac)
        deltas = jnp.stack(cands).astype(jnp.float32)
        sums = _score_candidates(x2d, deltas, self.n_levels)
        scores = sums / jnp.float32(n_true)      # lp_loss(p=2, reduction='all')
        best_score = jnp.float32(1e10)
        for d in range(int(deltas.shape[0])):
            take = scores[d] < best_score
            delta = jnp.where(take, deltas[d], delta)
            best_score = jnp.where(take, scores[d], best_score)
        return delta

    def __call__(self, x):
        orig_shape = x.shape
        orig_dtype = x.dtype
        n_true = int(x.size)
        x2d, padded = _prepare_slab(x)           # copy-free when n % 128 == 0
        if not self.inited:
            self.delta = self._init_quantization_scale(x, x2d, n_true)
            self.inited = True
        if self._scal is None:
            d = jnp.asarray(self.delta, jnp.float32)
            self._scal = jnp.stack([d, jnp.log2(d), d * jnp.float32(_SQRT2 - 1.0)])
        y2d = _quantize_slab(x2d, self._scal, self.n_levels, orig_dtype)
        if padded:
            return y2d.reshape(-1)[:n_true].reshape(orig_shape)
        return y2d.reshape(orig_shape)


# ----------------------------------------------------------------------------
# Pure-jnp reference (for self-check)
# ----------------------------------------------------------------------------
def _reference_forward(x, n_levels):
    def quant(v, d):
        x_int = jnp.round(-2.0 * jnp.log2(v / d))
        mask = x_int >= float(n_levels)
        q = jnp.clip(x_int, 0.0, float(n_levels - 1))
        odd = jnp.mod(q, 2.0) * (_SQRT2 - 1.0) + 1.0
        return jnp.where(mask, 0.0, jnp.exp2(-jnp.ceil(q * 0.5)) * odd * d)

    x_flat = x.reshape(-1).astype(jnp.float32)
    delta = jnp.max(x_flat)
    best = jnp.float32(1e10)
    for pct in _PCTS:
        nd = jnp.quantile(x_flat, pct).astype(jnp.float32)
        score = jnp.mean((x_flat - quant(x_flat, nd)) ** 2)
        take = score < best
        delta = jnp.where(take, nd, delta)
        best = jnp.where(take, score, best)
    return quant(x.astype(jnp.float32), delta).astype(x.dtype)


if __name__ == "__main__":
    key = jax.random.PRNGKey(0)
    # Positive activations (as this quantizer expects, e.g. post-softmax/ReLU).
    x = jax.random.uniform(
        key, (2, 4, 16, 16), dtype=jnp.float32, minval=1e-4, maxval=1.0
    )

    quantizer = LogSqrt2Quantizer(n_bits=8, channel_wise=False)
    y = jax.block_until_ready(quantizer(x))      # init path + quantize
    y2 = jax.block_until_ready(quantizer(x))     # steady-state path (delta cached)

    # Self-check against a pure-jnp reference (tolerant to rare rounding-edge
    # flips from the mathematically-equivalent log2 reformulation and to ulp
    # differences in the quantile interpolation).
    y_ref = jax.block_until_ready(_reference_forward(x, quantizer.n_levels))
    mismatch = float(jnp.mean(
        (jnp.abs(y - y_ref) > 1e-3 * (jnp.abs(y_ref) + 1e-6)).astype(jnp.float32)))
    assert y.shape == x.shape and y.dtype == x.dtype
    assert mismatch < 0.01, f"mismatch fraction too high: {mismatch}"
    assert bool(jnp.all(y == y2))

    print("KERNEL_OK")
</pallas_src>

<mosaic_0001>
module attributes {stable_mosaic.version = 11 : i64} {
  func.func @_score_kernel(%arg0: i32, %arg1: i32, %arg2: memref<3xf32, #tpu.memory_space<smem>>, %arg3: memref<3xf32, #tpu.memory_space<smem>>, %arg4: memref<3xf32, #tpu.memory_space<smem>>, %arg5: memref<16x128xf32, #tpu.memory_space<vmem>>, %arg6: memref<1x3x128xf32, #tpu.memory_space<vmem>>, %arg7: memref<3x16x128xf32, #tpu.memory_space<vmem>>) attributes {dimension_semantics = [#tpu.dimension_semantics<parallel>, #tpu.dimension_semantics<arbitrary>], iteration_bounds = array<i64: 1, 1>, scalar_prefetch = 3 : i64, scratch_operands = 1 : i64, tpu.core_type = #tpu.core_type<tc>, window_params = [{transform_indices = @transform_0, window_bounds = array<i64: 16, 128>}, {transform_indices = @transform_1, window_bounds = array<i64: 1, 3, 128>}]} {
    %c0_i32 = arith.constant 0 : i32
    %0 = arith.cmpi eq, %arg1, %c0_i32 : i32
    %1 = arith.extui %0 : i1 to i32
    %c0_i32_0 = arith.constant 0 : i32
    %2 = arith.cmpi ne, %1, %c0_i32_0 : i32
    scf.if %2 {
      %cst_47 = arith.constant 0.000000e+00 : f32
      %116 = vector.broadcast %cst_47 : f32 to vector<3x16x128xf32>
      %c0_48 = arith.constant 0 : index
      %c0_49 = arith.constant 0 : index
      %c0_50 = arith.constant 0 : index
      %117 = vector.load %arg7[%c0_48, %c0_49, %c0_50] : memref<3x16x128xf32, #tpu.memory_space<vmem>>, vector<3x16x128xf32>
      tpu.vector_store %arg7[%c0_48, %c0_49, %c0_50], %116 {strides = array<i32>} : memref<3x16x128xf32, #tpu.memory_space<vmem>>, vector<3x16x128xf32>,
    } else {
    }
    %c0 = arith.constant 0 : index
    %c0_1 = arith.constant 0 : index
    %3 = vector.load %arg5[%c0, %c0_1] : memref<16x128xf32, #tpu.memory_space<vmem>>, vector<16x128xf32>
    %4 = math.log %3 : vector<16x128xf32>
    %cst = arith.constant 2.000000e+00 : f32
    %5 = math.log %cst : f32
    %6 = vector.broadcast %5 : f32 to vector<16x128xf32>
    %7 = arith.divf %4, %6 : vector<16x128xf32>
    %c0_2 = arith.constant 0 : index
    %8 = memref.load %arg2[%c0_2] : memref<3xf32, #tpu.memory_space<smem>>
    %c0_3 = arith.constant 0 : index
    %9 = memref.load %arg3[%c0_3] : memref<3xf32, #tpu.memory_space<smem>>
    %c0_4 = arith.constant 0 : index
    %10 = memref.load %arg4[%c0_4] : memref<3xf32, #tpu.memory_space<smem>>
    %11 = vector.broadcast %9 : f32 to vector<16x128xf32>
    %12 = arith.subf %7, %11 : vector<16x128xf32>
    %cst_5 = arith.constant -2.000000e+00 : f32
    %13 = vector.broadcast %cst_5 : f32 to vector<16x128xf32>
    %14 = arith.mulf %13, %12 : vector<16x128xf32>
    %15 = math.roundeven %14 : vector<16x128xf32>
    %cst_6 = arith.constant 2.560000e+02 : f32
    %16 = vector.broadcast %cst_6 : f32 to vector<16x128xf32>
    %17 = arith.cmpf oge, %15, %16 : vector<16x128xf32>
    %cst_7 = arith.constant 0.000000e+00 : f32
    %18 = vector.broadcast %cst_7 : f32 to vector<16x128xf32>
    %19 = arith.maximumf %15, %18 : vector<16x128xf32>
    %cst_8 = arith.constant 5.000000e-01 : f32
    %20 = vector.broadcast %cst_8 : f32 to vector<16x128xf32>
    %21 = arith.mulf %19, %20 : vector<16x128xf32>
    %22 = math.ceil %21 : vector<16x128xf32>
    %23 = arith.addf %22, %22 : vector<16x128xf32>
    %24 = arith.subf %23, %19 : vector<16x128xf32>
    %cst_9 = arith.constant 0.000000e+00 : f32
    %25 = vector.broadcast %cst_9 : f32 to vector<16x128xf32>
    %26 = arith.subf %25, %22 : vector<16x128xf32>
    %27 = math.exp2 %26 : vector<16x128xf32>
    %28 = vector.broadcast %10 : f32 to vector<16x128xf32>
    %29 = arith.mulf %24, %28 : vector<16x128xf32>
    %30 = vector.broadcast %8 : f32 to vector<16x128xf32>
    %31 = arith.addf %29, %30 : vector<16x128xf32>
    %32 = arith.mulf %27, %31 : vector<16x128xf32>
    %cst_10 = arith.constant 0.000000e+00 : f32
    %33 = vector.broadcast %cst_10 : f32 to vector<16x128xf32>
    %34 = arith.select %17, %33, %32 : vector<16x128xi1>, vector<16x128xf32>
    %35 = arith.subf %3, %34 : vector<16x128xf32>
    %c0_11 = arith.constant 0 : index
    %c0_12 = arith.constant 0 : index
    %c0_13 = arith.constant 0 : index
    %36 = vector.load %arg7[%c0_11, %c0_12, %c0_13] : memref<3x16x128xf32, #tpu.memory_space<vmem>>, vector<1x16x128xf32>
    %37 = vector.shape_cast %36 : vector<1x16x128xf32> to vector<16x128xf32>
    %38 = arith.mulf %35, %35 : vector<16x128xf32>
    %39 = arith.addf %37, %38 : vector<16x128xf32>
    %c0_14 = arith.constant 0 : index
    %c0_15 = arith.constant 0 : index
    %c0_16 = arith.constant 0 : index
    %40 = vector.load %arg7[%c0_14, %c0_15, %c0_16] : memref<3x16x128xf32, #tpu.memory_space<vmem>>, vector<1x16x128xf32>
    %41 = vector.shape_cast %40 : vector<1x16x128xf32> to vector<16x128xf32>
    %42 = vector.shape_cast %39 : vector<16x128xf32> to vector<1x16x128xf32>
    tpu.vector_store %arg7[%c0_14, %c0_15, %c0_16], %42 {strides = array<i32>} : memref<3x16x128xf32, #tpu.memory_space<vmem>>, vector<1x16x128xf32>,
    %c1 = arith.constant 1 : index
    %43 = memref.load %arg2[%c1] : memref<3xf32, #tpu.memory_space<smem>>
    %c1_17 = arith.constant 1 : index
    %44 = memref.load %arg3[%c1_17] : memref<3xf32, #tpu.memory_space<smem>>
    %c1_18 = arith.constant 1 : index
    %45 = memref.load %arg4[%c1_18] : memref<3xf32, #tpu.memory_space<smem>>
    %46 = vector.broadcast %44 : f32 to vector<16x128xf32>
    %47 = arith.subf %7, %46 : vector<16x128xf32>
    %cst_19 = arith.constant -2.000000e+00 : f32
    %48 = vector.broadcast %cst_19 : f32 to vector<16x128xf32>
    %49 = arith.mulf %48, %47 : vector<16x128xf32>
    %50 = math.roundeven %49 : vector<16x128xf32>
    %cst_20 = arith.constant 2.560000e+02 : f32
    %51 = vector.broadcast %cst_20 : f32 to vector<16x128xf32>
    %52 = arith.cmpf oge, %50, %51 : vector<16x128xf32>
    %cst_21 = arith.constant 0.000000e+00 : f32
    %53 = vector.broadcast %cst_21 : f32 to vector<16x128xf32>
    %54 = arith.maximumf %50, %53 : vector<16x128xf32>
    %cst_22 = arith.constant 5.000000e-01 : f32
    %55 = vector.broadcast %cst_22 : f32 to vector<16x128xf32>
    %56 = arith.mulf %54, %55 : vector<16x128xf32>
    %57 = math.ceil %56 : vector<16x128xf32>
    %58 = arith.addf %57, %57 : vector<16x128xf32>
    %59 = arith.subf %58, %54 : vector<16x128xf32>
    %cst_23 = arith.constant 0.000000e+00 : f32
    %60 = vector.broadcast %cst_23 : f32 to vector<16x128xf32>
    %61 = arith.subf %60, %57 : vector<16x128xf32>
    %62 = math.exp2 %61 : vector<16x128xf32>
    %63 = vector.broadcast %45 : f32 to vector<16x128xf32>
    %64 = arith.mulf %59, %63 : vector<16x128xf32>
    %65 = vector.broadcast %43 : f32 to vector<16x128xf32>
    %66 = arith.addf %64, %65 : vector<16x128xf32>
    %67 = arith.mulf %62, %66 : vector<16x128xf32>
    %cst_24 = arith.constant 0.000000e+00 : f32
    %68 = vector.broadcast %cst_24 : f32 to vector<16x128xf32>
    %69 = arith.select %52, %68, %67 : vector<16x128xi1>, vector<16x128xf32>
    %70 = arith.subf %3, %69 : vector<16x128xf32>
    %c1_25 = arith.constant 1 : index
    %c0_26 = arith.constant 0 : index
    %c0_27 = arith.constant 0 : index
    %71 = vector.load %arg7[%c1_25, %c0_26, %c0_27] : memref<3x16x128xf32, #tpu.memory_space<vmem>>, vector<1x16x128xf32>
    %72 = vector.shape_cast %71 : vector<1x16x128xf32> to vector<16x128xf32>
    %73 = arith.mulf %70, %70 : vector<16x128xf32>
    %74 = arith.addf %72, %73 : vector<16x128xf32>
    %c1_28 = arith.constant 1 : index
    %c0_29 = arith.constant 0 : index
    %c0_30 = arith.constant 0 : index
    %75 = vector.load %arg7[%c1_28, %c0_29, %c0_30] : memref<3x16x128xf32, #tpu.memory_space<vmem>>, vector<1x16x128xf32>
    %76 = vector.shape_cast %75 : vector<1x16x128xf32> to vector<16x128xf32>
    %77 = vector.shape_cast %74 : vector<16x128xf32> to vector<1x16x128xf32>
    tpu.vector_store %arg7[%c1_28, %c0_29, %c0_30], %77 {strides = array<i32>} : memref<3x16x128xf32, #tpu.memory_space<vmem>>, vector<1x16x128xf32>,
    %c2 = arith.constant 2 : index
    %78 = memref.load %arg2[%c2] : memref<3xf32, #tpu.memory_space<smem>>
    %c2_31 = arith.constant 2 : index
    %79 = memref.load %arg3[%c2_31] : memref<3xf32, #tpu.memory_space<smem>>
    %c2_32 = arith.constant 2 : index
    %80 = memref.load %arg4[%c2_32] : memref<3xf32, #tpu.memory_space<smem>>
    %81 = vector.broadcast %79 : f32 to vector<16x128xf32>
    %82 = arith.subf %7, %81 : vector<16x128xf32>
    %cst_33 = arith.constant -2.000000e+00 : f32
    %83 = vector.broadcast %cst_33 : f32 to vector<16x128xf32>
    %84 = arith.mulf %83, %82 : vector<16x128xf32>
    %85 = math.roundeven %84 : vector<16x128xf32>
    %cst_34 = arith.constant 2.560000e+02 : f32
    %86 = vector.broadcast %cst_34 : f32 to vector<16x128xf32>
    %87 = arith.cmpf oge, %85, %86 : vector<16x128xf32>
    %cst_35 = arith.constant 0.000000e+00 : f32
    %88 = vector.broadcast %cst_35 : f32 to vector<16x128xf32>
    %89 = arith.maximumf %85, %88 : vector<16x128xf32>
    %cst_36 = arith.constant 5.000000e-01 : f32
    %90 = vector.broadcast %cst_36 : f32 to vector<16x128xf32>
    %91 = arith.mulf %89, %90 : vector<16x128xf32>
    %92 = math.ceil %91 : vector<16x128xf32>
    %93 = arith.addf %92, %92 : vector<16x128xf32>
    %94 = arith.subf %93, %89 : vector<16x128xf32>
    %cst_37 = arith.constant 0.000000e+00 : f32
    %95 = vector.broadcast %cst_37 : f32 to vector<16x128xf32>
    %96 = arith.subf %95, %92 : vector<16x128xf32>
    %97 = math.exp2 %96 : vector<16x128xf32>
    %98 = vector.broadcast %80 : f32 to vector<16x128xf32>
    %99 = arith.mulf %94, %98 : vector<16x128xf32>
    %100 = vector.broadcast %78 : f32 to vector<16x128xf32>
    %101 = arith.addf %99, %100 : vector<16x128xf32>
    %102 = arith.mulf %97, %101 : vector<16x128xf32>
    %cst_38 = arith.constant 0.000000e+00 : f32
    %103 = vector.broadcast %cst_38 : f32 to vector<16x128xf32>
    %104 = arith.select %87, %103, %102 : vector<16x128xi1>, vector<16x128xf32>
    %105 = arith.subf %3, %104 : vector<16x128xf32>
    %c2_39 = arith.constant 2 : index
    %c0_40 = arith.constant 0 : index
    %c0_41 = arith.constant 0 : index
    %106 = vector.load %arg7[%c2_39, %c0_40, %c0_41] : memref<3x16x128xf32, #tpu.memory_space<vmem>>, vector<1x16x128xf32>
    %107 = vector.shape_cast %106 : vector<1x16x128xf32> to vector<16x128xf32>
    %108 = arith.mulf %105, %105 : vector<16x128xf32>
    %109 = arith.addf %107, %108 : vector<16x128xf32>
    %c2_42 = arith.constant 2 : index
    %c0_43 = arith.constant 0 : index
    %c0_44 = arith.constant 0 : index
    %110 = vector.load %arg7[%c2_42, %c0_43, %c0_44] : memref<3x16x128xf32, #tpu.memory_space<vmem>>, vector<1x16x128xf32>
    %111 = vector.shape_cast %110 : vector<1x16x128xf32> to vector<16x128xf32>
    %112 = vector.shape_cast %109 : vector<16x128xf32> to vector<1x16x128xf32>
    tpu.vector_store %arg7[%c2_42, %c0_43, %c0_44], %112 {strides = array<i32>} : memref<3x16x128xf32, #tpu.memory_space<vmem>>, vector<1x16x128xf32>,
    %c0_i32_45 = arith.constant 0 : i32
    %113 = arith.cmpi eq, %arg1, %c0_i32_45 : i32
    %114 = arith.extui %113 : i1 to i32
    %c0_i32_46 = arith.constant 0 : i32
    %115 = arith.cmpi ne, %114, %c0_i32_46 : i32
    scf.if %115 {
      %c0_47 = arith.constant 0 : index
      %c0_48 = arith.constant 0 : index
      %c0_49 = arith.constant 0 : index
      %116 = vector.load %arg7[%c0_47, %c0_48, %c0_49] : memref<3x16x128xf32, #tpu.memory_space<vmem>>, vector<1x16x128xf32>
      %117 = vector.shape_cast %116 : vector<1x16x128xf32> to vector<16x128xf32>
      %cst_50 = arith.constant dense<0.000000e+00> : vector<128xf32>
      %118 = vector.multi_reduction <add>, %117, %cst_50 [0] : vector<16x128xf32> to vector<128xf32>
      %c0_51 = arith.constant 0 : index
      %c0_52 = arith.constant 0 : index
      %c0_53 = arith.constant 0 : index
      %119 = vector.load %arg6[%c0_51, %c0_52, %c0_53] : memref<1x3x128xf32, #tpu.memory_space<vmem>>, vector<1x1x128xf32>
      %120 = vector.shape_cast %119 : vector<1x1x128xf32> to vector<128xf32>
      %121 = vector.shape_cast %118 : vector<128xf32> to vector<1x1x128xf32>
      tpu.vector_store %arg6[%c0_51, %c0_52, %c0_53], %121 {strides = array<i32>} : memref<1x3x128xf32, #tpu.memory_space<vmem>>, vector<1x1x128xf32>,
      %c1_54 = arith.constant 1 : index
      %c0_55 = arith.constant 0 : index
      %c0_56 = arith.constant 0 : index
      %122 = vector.load %arg7[%c1_54, %c0_55, %c0_56] : memref<3x16x128xf32, #tpu.memory_space<vmem>>, vector<1x16x128xf32>
      %123 = vector.shape_cast %122 : vector<1x16x128xf32> to vector<16x128xf32>
      %cst_57 = arith.constant dense<0.000000e+00> : vector<128xf32>
      %124 = vector.multi_reduction <add>, %123, %cst_57 [0] : vector<16x128xf32> to vector<128xf32>
      %c0_58 = arith.constant 0 : index
      %c1_59 = arith.constant 1 : index
      %c0_60 = arith.constant 0 : index
      %125 = vector.load %arg6[%c0_58, %c1_59, %c0_60] : memref<1x3x128xf32, #tpu.memory_space<vmem>>, vector<1x1x128xf32>
      %126 = vector.shape_cast %125 : vector<1x1x128xf32> to vector<128xf32>
      %127 = vector.shape_cast %124 : vector<128xf32> to vector<1x1x128xf32>
      tpu.vector_store %arg6[%c0_58, %c1_59, %c0_60], %127 {strides = array<i32>} : memref<1x3x128xf32, #tpu.memory_space<vmem>>, vector<1x1x128xf32>,
      %c2_61 = arith.constant 2 : index
      %c0_62 = arith.constant 0 : index
      %c0_63 = arith.constant 0 : index
      %128 = vector.load %arg7[%c2_61, %c0_62, %c0_63] : memref<3x16x128xf32, #tpu.memory_space<vmem>>, vector<1x16x128xf32>
      %129 = vector.shape_cast %128 : vector<1x16x128xf32> to vector<16x128xf32>
      %cst_64 = arith.constant dense<0.000000e+00> : vector<128xf32>
      %130 = vector.multi_reduction <add>, %129, %cst_64 [0] : vector<16x128xf32> to vector<128xf32>
      %c0_65 = arith.constant 0 : index
      %c2_66 = arith.constant 2 : index
      %c0_67 = arith.constant 0 : index
      %131 = vector.load %arg6[%c0_65, %c2_66, %c0_67] : memref<1x3x128xf32, #tpu.memory_space<vmem>>, vector<1x1x128xf32>
      %132 = vector.shape_cast %131 : vector<1x1x128xf32> to vector<128xf32>
      %133 = vector.shape_cast %130 : vector<128xf32> to vector<1x1x128xf32>
      tpu.vector_store %arg6[%c0_65, %c2_66, %c0_67], %133 {strides = array<i32>} : memref<1x3x128xf32, #tpu.memory_space<vmem>>, vector<1x1x128xf32>,
    } else {
    }
    return
  }
  func.func @transform_0(%arg0: i32, %arg1: i32, %arg2: memref<3xf32, #tpu.memory_space<smem>>, %arg3: memref<3xf32, #tpu.memory_space<smem>>, %arg4: memref<3xf32, #tpu.memory_space<smem>>) -> (i32, i32) {
    %c1_i32 = arith.constant 1 : i32
    %0 = arith.muli %arg0, %c1_i32 : i32
    %1 = arith.addi %0, %arg1 : i32
    %c0_i32 = arith.constant 0 : i32
    %c0_i32_0 = arith.constant 0 : i32
    return %1, %c0_i32 : i32, i32
  }
  func.func @transform_1(%arg0: i32, %arg1: i32, %arg2: memref<3xf32, #tpu.memory_space<smem>>, %arg3: memref<3xf32, #tpu.memory_space<smem>>, %arg4: memref<3xf32, #tpu.memory_space<smem>>) -> (i32, i32, i32) {
    %c0_i32 = arith.constant 0 : i32
    %c0_i32_0 = arith.constant 0 : i32
    %c0_i32_1 = arith.constant 0 : i32
    return %arg0, %c0_i32, %c0_i32_0 : i32, i32, i32
  }
}

</mosaic_0001>

<bundles_post_ra>
// kernel: tpu_custom_call.1
= control target key start
LH: loop header
LB: loop body
LE: loop exit
PB: predicated region body
PF: predicated region fallthrough
CT: control target
= control target key end

     0   :  { %s488_s0 = inlined_call_operand.hbm [shape: f32[3], index: 0, kind: input, shape index: {}]   ;;  %s489_s3 = inlined_call_operand.hbm [shape: f32[16,128], index: 3, kind: input, shape index: {}]   ;;  %s490_s4 = inlined_call_operand.vmem [shape: f32[1,3,128], index: 4, kind: output, shape index: {}]   ;;  %s491_s1 = inlined_call_operand.vmem [shape: f32[3], index: 1, kind: input, shape index: {}]   ;;  %s492_s2 = inlined_call_operand.vmem [shape: f32[3], index: 2, kind: input, shape index: {}]  }
   0x1   :  { %s274_s17 = scalar_lea.hbm %s488_s0, 16 }
   0x2   :  { %p275_p0 = scmp.ne.s32.totalorder %s488_s0, %s274_s17  ;;  %p278_p1 = scmp.lt.u32.totalorder %s274_s17, %s488_s0 }
   0x4   :  { %p280_p2 = pnand %p278_p1, %p275_p0 }
   0x6   :  { %283 = shalt.err (!%p280_p2)  }
   0x7   :  { %s334_s22 = smov [#allocation4]   ;;  %s11_s27 = sshll.u32 %s491_s1, 4  ;;  %s12_s27 = int_to_ptr.vmem [resolvable:$true] %s11_s27 }
   0x8   :  { %10 = dma.hbm_to_smem %s488_s0, 16, %s334_s22, [#allocation3] }
   0x9   :  { %s15_s30 = sshll.u32 %s492_s2, 4  ;;  %s284_s5 = scalar_lea.vmem %s12_s27, 16  ;;  %s16_s30 = int_to_ptr.vmem [resolvable:$true] %s15_s30 }
   0xa   :  { %p285_p3 = scmp.ne.s32.totalorder %s12_s27, %s284_s5  ;;  %p289_p4 = scmp.lt.s32.totalorder %s12_s27, %s12_s27 }
   0xb   :  { %p290_p5 = scmp.lt.s32.totalorder %s284_s5, %s284_s5 }
   0xd   :  { %p291_p6 = por %p290_p5, %p289_p4 }
   0xf   :  { %p292_p7 = pnand %p291_p6, %p285_p3 }
  0x11   :  { %295 = shalt.err (!%p292_p7)  }
  0x12   :  { %s335_s6 = smov [#allocation5]   ;;  %s296_s0 = scalar_lea.vmem %s16_s30, 16 }
  0x13   :  { %14 = dma.vmem_to_smem %s12_s27, 16, %s335_s6, [#allocation3] }
  0x14   :  { %p297_p8 = scmp.ne.s32.totalorder %s16_s30, %s296_s0  ;;  %p301_p9 = scmp.lt.s32.totalorder %s16_s30, %s16_s30 }
  0x15   :  { %p302_p10 = scmp.lt.s32.totalorder %s296_s0, %s296_s0 }
  0x17   :  { %p303_p11 = por %p302_p10, %p301_p9 }
  0x19   :  { %p304_p12 = pnand %p303_p11, %p297_p8 }
  0x1b   :  { %307 = shalt.err (!%p304_p12)  }
  0x1c   :  { %s336_s1 = smov [#allocation6]  }
  0x1d   :  { %18 = dma.vmem_to_smem %s16_s30, 16, %s336_s1, [#allocation3] }
  0x1e   :  { %330 = dma.done.wait [#allocation3], 48 }
  0x1f   :  { %331 = vsyncadd [#allocation3], 4294967248 }
  0x20   :  { %20 = sfence }
  0x21   :  { %21 = vsyncpa [#allocation8], 0  ;;  %s337_s2 = smov [#allocation7]   ;;  %s308_s10 = scalar_lea.hbm %s489_s3, 256 }
  0x22   :  { %s31_s7 = sshll.u32 %s337_s2, 4  ;;  %p309_p13 = scmp.ne.s32.totalorder %s489_s3, %s308_s10  ;;  %s32_s7 = int_to_ptr.vmem [resolvable:$true] %s31_s7 }
  0x23   :  { %p312_p0 = scmp.lt.u32.totalorder %s308_s10, %s489_s3 }
  0x25   :  { %p314_p1 = pnand %p312_p0, %p309_p13 }
  0x27   :  { %317 = shalt.err (!%p314_p1)
}
  0x28   :  { %s318_s15 = scalar_lea.vmem %s32_s7, 256  ;;  %p323_p3 = scmp.lt.s32.totalorder %s32_s7, %s32_s7 }
  0x29   :  { %p319_p2 = scmp.ne.s32.totalorder %s32_s7, %s318_s15  ;;  %p324_p4 = scmp.lt.s32.totalorder %s318_s15, %s318_s15 }
  0x2b   :  { %p325_p5 = por %p324_p4, %p323_p3 }
  0x2d   :  { %p326_p6 = pnand %p325_p5, %p319_p2 }
  0x2f   :  { %329 = shalt.err (!%p326_p6)
}
  0x30   :  { %s338_s16 = smov 128   ;;  %s339_s17 = smov 8  }
  0x31   :  { %37 = dma.hbm_to_vmem [thread:$0]  %s489_s3, 256, %s32_s7, [#allocation8], %s338_s16, %s338_s16, %s339_s17  }
  0x32   :  { %332 = dma.done.wait [#allocation8], 256  }
  0x33   :  { %333 = vsyncadd [#allocation8], 4294967040  ;;  %v395_v0 = vld [vmem:[#allocation7] sm:$0xff]  ;;  %v397_v1 = vld [vmem:[#allocation7 + $0x8] sm:$0xff]  ;;  %s63_s20 = sld [smem:[#allocation5]]  ;;  %s241_s21 = sld [smem:[#allocation5 + $0x1]] }
  0x34   :  { %258 = vlog2.f32 %v395_v0  ;;  %s244_s22 = sld [smem:[#allocation5 + $0x2]]  ;;  %s419_s3 = sld [smem:[#allocation6]] }
  0x35   :  { %260 = vlog2.f32 %v397_v1  ;;  %s429_s23 = sld [smem:[#allocation6 + $0x1]]  ;;  %s435_s24 = sld [smem:[#allocation4]] }
  0x36   :  { %s437_s25 = sld [smem:[#allocation4 + $0x1]]  ;;  %s439_s26 = sld [smem:[#allocation6 + $0x2]] }
  0x37   :  { %s443_s27 = sld [smem:[#allocation4 + $0x2]] }
  0x39   :  { %v65_v6 = vstv %s63_s20  ;;  %v111_v7 = vstv %s241_s21 }
  0x3a   :  { %v158_v8 = vstv %s244_s22  ;;  %v88_v54 = vstv %s419_s3 }
  0x3b   :  { %v134_v60 = vstv %s429_s23 }
  0x3e   :  { %v259_v2 = vpop.eup %258 }
  0x3f   :  { %v261_v3 = vpop.eup %260  ;;  %v56_v4 = vmul.f32 0.6931472, %v259_v2 }
  0x40   :  { %v58_v5 = vmul.f32 0.6931472, %v261_v3  ;;  %v91_v3 = vstv %s435_s24 }
  0x41   :  { %v60_v9 = vmul.f32 1.442695, %v56_v4 }
  0x42   :  { %v61_v10 = vmul.f32 1.442695, %v58_v5 }
  0x43   :  { %v66_v11 = vsub.f32 %v60_v9, %v65_v6  ;;  %v112_v12 = vsub.f32 %v60_v9, %v111_v7  ;;  %v159_v13 = vsub.f32 %v60_v9, %v158_v8 }
  0x44   :  { %v67_v14 = vsub.f32 %v61_v10, %v65_v6  ;;  %v113_v15 = vsub.f32 %v61_v10, %v111_v7  ;;  %v160_v16 = vsub.f32 %v61_v10, %v158_v8  ;;  %v137_v6 = vstv %s437_s25 }
  0x45   :  { %v401_v17 = vmul.f32 -2.0, %v66_v11  ;;  %v403_v18 = vmul.f32 -2.0, %v112_v12  ;;  %v405_v19 = vmul.f32 -2.0, %v159_v13  ;;  %v181_v11 = vstv %s439_s26 }
  0x46   :  { %v407_v20 = vmul.f32 -2.0, %v67_v14  ;;  %v409_v21 = vmul.f32 -2.0, %v113_v15  ;;  %v411_v22 = vmul.f32 -2.0, %v160_v16 }
  0x47   :  { %v246_v23 = vround.rtne.f32 %v401_v17  ;;  %v248_v24 = vround.rtne.f32 %v403_v18  ;;  %v250_v27 = vround.rtne.f32 %v405_v19 }
  0x48   :  { %v247_v25 = vround.rtne.f32 %v407_v20  ;;  %v249_v26 = vround.rtne.f32 %v409_v21  ;;  %v251_v28 = vround.rtne.f32 %v411_v22 }
  0x49   :  { %v74_v29 = vmax.f32 %v246_v23, 0.0  ;;  %v120_v30 = vmax.f32 %v248_v24, 0.0  ;;  %v167_v37 = vmax.f32 %v250_v27, 0.0  ;;  %vm450_vm0 = vcmp.ge.f32.partialorder %v246_v23, 256.0 }
  0x4a   :  { %v75_v31 = vmax.f32 %v247_v25, 0.0  ;;  %v121_v32 = vmax.f32 %v249_v26, 0.0  ;;  %v168_v38 = vmax.f32 %v251_v28, 0.0  ;;  %vm73_vm1 = vcmp.ge.f32.partialorder %v247_v25, 256.0 }
  0x4b   :  { %v76_v33 = vmul.f32 0.5, %v74_v29  ;;  %v122_v34 = vmul.f32 0.5, %v120_v30  ;;  %v169_v43 = vmul.f32 0.5, %v167_v37  ;;  %vm118_vm2 = vcmp.ge.f32.partialorder %v248_v24, 256.0 }
  0x4c   :  { %v77_v35 = vmul.f32 0.5, %v75_v31  ;;  %v123_v36 = vmul.f32 0.5, %v121_v32  ;;  %v170_v44 = vmul.f32 0.5, %v168_v38  ;;  %vm463_vm3 = vcmp.ge.f32.partialorder %v249_v26, 256.0 }
  0x4d   :  { %v78_v39 = vceil.f32 %v76_v33  ;;  %v124_v40 = vceil.f32 %v122_v34  ;;  %v171_v55 = vceil.f32 %v169_v43  ;;  %vm165_vm4 = vcmp.ge.f32.partialorder %v250_v27, 256.0 }
  0x4e   :  { %v79_v41 = vceil.f32 %v77_v35  ;;  %v125_v42 = vceil.f32 %v123_v36  ;;  %v172_v58 = vceil.f32 %v170_v44  ;;  %vm166_vm5 = vcmp.ge.f32.partialorder %v251_v28, 256.0 }
  0x4f   :  { %v80_v45 = vadd.f32 %v78_v39, %v78_v39  ;;  %v84_v46 = vsub.f32 0.0, %v78_v39  ;;  %v126_v47 = vadd.f32 %v124_v40, %v124_v40  ;;  %v130_v48 = vsub.f32 0.0, %v124_v40 }
  0x50   :  { %v81_v49 = vadd.f32 %v79_v41, %v79_v41  ;;  %v85_v50 = vsub.f32 0.0, %v79_v41  ;;  %v127_v51 = vadd.f32 %v125_v42, %v125_v42  ;;  %v131_v52 = vsub.f32 0.0, %v125_v42 }
  0x51   :  { %v82_v53 = vsub.f32 %v80_v45, %v74_v29  ;;  %262 = vpow2.f32 %v84_v46  ;;  %v128_v57 = vsub.f32 %v126_v47, %v120_v30  ;;  %v173_v61 = vadd.f32 %v171_v55, %v171_v55 }
  0x52   :  { %v83_v56 = vsub.f32 %v81_v49, %v75_v31  ;;  %264 = vpow2.f32 %v85_v50  ;;  %v129_v59 = vsub.f32 %v127_v51, %v121_v32  ;;  %v174_v63 = vadd.f32 %v172_v58, %v172_v58 }
  0x53   :  { %266 = vpow2.f32 %v130_v48  ;;  %v89_v62 = vmul.f32 %v88_v54, %v82_v53  ;;  %v177_v4 = vsub.f32 0.0, %v171_v55  ;;  %v135_v5 = vmul.f32 %v134_v60, %v128_v57 }
  0x54   :  { %268 = vpow2.f32 %v131_v52  ;;  %v90_v2 = vmul.f32 %v88_v54, %v83_v56  ;;  %v175_v7 = vsub.f32 %v173_v61, %v167_v37  ;;  %v178_v8 = vsub.f32 0.0, %v172_v58 }
  0x55   :  { %v136_v9 = vmul.f32 %v134_v60, %v129_v59  ;;  %v176_v10 = vsub.f32 %v174_v63, %v168_v38  ;;  %270 = vpow2.f32 %v177_v4  ;;  %v92_v12 = vadd.f32 %v91_v3, %v89_v62 }
  0x56   :  { %272 = vpow2.f32 %v178_v8  ;;  %v93_v13 = vadd.f32 %v91_v3, %v90_v2  ;;  %v138_v14 = vadd.f32 %v137_v6, %v135_v5  ;;  %v182_v15 = vmul.f32 %v181_v11, %v175_v7 }
  0x57   :  { %v139_v30 = vadd.f32 %v137_v6, %v136_v9  ;;  %v183_v31 = vmul.f32 %v181_v11, %v176_v10  ;;  %v184_v32 = vstv %s443_s27 }
  0x58   :  { %v185_v39 = vadd.f32 %v184_v32, %v182_v15 }
  0x59   :  { %v186_v41 = vadd.f32 %v184_v32, %v183_v31 }
  0x5b   :  { %v263_v16 = vpop.eup %262 }
  0x5c   :  { %v265_v33 = vpop.eup %264  ;;  %v94_v34 = vmul.f32 %v263_v16, %v92_v12 }
  0x5d   :  { %v267_v35 = vpop.eup %266  ;;  %v95_v36 = vmul.f32 %v265_v33, %v93_v13 }
  0x5e   :  { %v269_v37 = vpop.eup %268  ;;  %v96_v17 = vsel %vm450_vm0, 0.0, %v94_v34  ;;  %v140_v38 = vmul.f32 %v267_v35, %v138_v14 }
  0x5f   :  { %v97_v20 = vsel %vm73_vm1, 0.0, %v95_v36  ;;  %v98_v25 = vsub.f32 %v395_v0, %v96_v17  ;;  %v141_v40 = vmul.f32 %v269_v37, %v139_v30  ;;  %v271_v42 = vpop.eup %270 }
  0x60   :  { %v99_v18 = vsub.f32 %v397_v1, %v97_v20  ;;  %v142_v24 = vsel %vm118_vm2, 0.0, %v140_v38  ;;  %v273_v26 = vpop.eup %272  ;;  %v187_v47 = vmul.f32 %v271_v42, %v185_v39 }
  0x61   :  { %v102_v43 = vmul.f32 %v98_v25, %v98_v25  ;;  %v143_v44 = vsel %vm463_vm3, 0.0, %v141_v40  ;;  %v144_v21 = vsub.f32 %v395_v0, %v142_v24  ;;  %v188_v49 = vmul.f32 %v273_v26, %v186_v41 }
  0x62   :  { %v103_v45 = vmul.f32 %v99_v18, %v99_v18  ;;  %v145_v46 = vsub.f32 %v397_v1, %v143_v44  ;;  %v189_v52 = vsel %vm165_vm4, 0.0, %v187_v47 }
  0x63   :  { %v149_v48 = vmul.f32 %v144_v21, %v144_v21  ;;  %v190_v53 = vsel %vm166_vm5, 0.0, %v188_v49  ;;  %v191_v54 = vsub.f32 %v395_v0, %v189_v52 }
  0x64   :  { %v207_v50 = vadd.f32 %v103_v45, %v102_v43  ;;  %v150_v51 = vmul.f32 %v145_v46, %v145_v46  ;;  %v192_v19 = vsub.f32 %v397_v1, %v190_v53 }
  0x65   :  { %v196_v27 = vmul.f32 %v191_v54, %v191_v54 }
  0x66   :  { %v208_v55 = vrot.slane %v207_v50, 4  ;;  %v217_v56 = vadd.f32 %v150_v51, %v149_v48  ;;  %v197_v59 = vmul.f32 %v192_v19, %v192_v19 }
  0x68   :  { %v209_v57 = vadd.f32 %v208_v55, %v207_v50  ;;  %v218_v58 = vrot.slane %v217_v56, 4  ;;  %v227_v28 = vadd.f32 %v197_v59, %v196_v27 }
  0x6a   :  { %v210_v60 = vrot.slane %v209_v57, 2  ;;  %v219_v22 = vadd.f32 %v218_v58, %v217_v56  ;;  %v228_v63 = vrot.slane %v227_v28, 4 }
  0x6c   :  { %v211_v61 = vadd.f32 %v210_v60, %v209_v57  ;;  %v220_v62 = vrot.slane %v219_v22, 2  ;;  %v229_v4 = vadd.f32 %v228_v63, %v227_v28 }
  0x6e   :  { %v212_v2 = vrot.slane %v211_v61, 1  ;;  %v221_v3 = vadd.f32 %v220_v62, %v219_v22  ;;  %v230_v0 = vrot.slane %v229_v4, 2 }
  0x70   :  { %v213_v5 = vadd.f32 %v212_v2, %v211_v61  ;;  %v222_v6 = vrot.slane %v221_v3, 1  ;;  %v231_v7 = vadd.f32 %v230_v0, %v229_v4 }
  0x72   :  { %214 = vst [vmem:[%s490_s4] sm:$0x1] %v213_v5  ;;  %v223_v1 = vadd.f32 %v222_v6, %v221_v3  ;;  %v232_v8 = vrot.slane %v231_v7, 1 }
  0x74   :  { %224 = vst [vmem:[%s490_s4 + $0x1] sm:$0x1] %v223_v1  ;;  %v233_v9 = vadd.f32 %v232_v8, %v231_v7 }
  0x76   :  { %234 = vst [vmem:[%s490_s4 + $0x2] sm:$0x1] %v233_v9 }
  0x77   :  { %239 = vsyncpa [#allocation8], 1 }

</bundles_post_ra>
